<compile_context>
chip_gen: v6e
topology: v6e:2x2x1
jax: 0.10.0
libtpu: 0.0.40
codegen_flags: <defaults>
</compile_context>

<pallas_src>
import math

import jax
import jax.numpy as jnp
from jax.experimental import pallas as pl
from jax.experimental.pallas import tpu as pltpu


def _layernorm(x, gamma, beta, eps=1e-5):
    # PyTorch LayerNorm: biased variance over the last dim, f32 math.
    mean = jnp.mean(x, axis=-1, keepdims=True)
    var = jnp.mean((x - mean) ** 2, axis=-1, keepdims=True)
    return (x - mean) * jax.lax.rsqrt(var + eps) * gamma + beta


def _softmax_last(x):
    m = jnp.max(x, axis=-1, keepdims=True)
    e = jnp.exp(x - m)
    # approx reciprocal runs on the EUP slot (otherwise idle here).
    return e * pl.reciprocal(jnp.sum(e, axis=-1, keepdims=True), approx=True)


def _pos_attn_kernel(
    x_ref,        # (TB, Li, Vin)  f32
    wk_ref,       # (Vin, H)       bf16
    bp_ref,       # (Li, H)        f32   (key bias + positional emb, pre-folded)
    q_ref,        # (Lo, H)        f32
    g1_ref,       # (1, H)
    b1_ref,       # (1, H)
    g2_ref,       # (1, H)
    b2_ref,       # (1, H)
    wf_ref,       # (H, Vout)      bf16
    bf_ref,       # (1, Vout)      f32
    logits_ref,   # (TB, Lo, Vout)
    attn_ref,     # (TB, Lo, Li)
    sattn_ref,    # (TB, Lo, Lo)
):
    TB, Li, Vin = x_ref.shape
    Lo, H = q_ref.shape
    Vout = wf_ref.shape[1]
    inv_scale = jnp.float32(1.0 / math.sqrt(H))

    # --- key_val = Linear(x) + (bias + positional_emb); batch folded into M ---
    x_flat = x_ref[...].reshape(TB * Li, Vin).astype(jnp.bfloat16)
    kv = jnp.dot(x_flat, wk_ref[...], preferred_element_type=jnp.float32)
    kv = kv.reshape(TB, Li, H) + bp_ref[...]            # (TB, Li, H) f32
    kv_bf = kv.astype(jnp.bfloat16)

    q = q_ref[...]                                      # (Lo, H) f32, shared
    # 1/sqrt(H) folded into the (batch-invariant) query used on the MXU;
    # broadcast hoisted once per grid step (JAX does not CSE broadcast_in_dim).
    q_scaled_bf = jnp.broadcast_to(q * inv_scale, (TB, Lo, H)).astype(jnp.bfloat16)

    # --- cross attention: query attends to key_val (no explicit transpose) ---
    scores = jnp.einsum('bqd,bkd->bqk', q_scaled_bf, kv_bf,
                        preferred_element_type=jnp.float32)
    attn_w = _softmax_last(scores)                      # (TB, Lo, Li) f32
    dec = jnp.einsum('bqk,bkd->bqd', attn_w.astype(jnp.bfloat16), kv_bf,
                     preferred_element_type=jnp.float32) + q   # residual (bcast)
    dec = _layernorm(dec, g1_ref[...], b1_ref[...])     # (TB, Lo, H) f32

    # --- self attention ---
    dec_bf = dec.astype(jnp.bfloat16)
    s2 = jnp.einsum('bqd,bkd->bqk', dec_bf, dec_bf,
                    preferred_element_type=jnp.float32) * inv_scale
    self_attn_w = _softmax_last(s2)                     # (TB, Lo, Lo) f32
    dec2 = jnp.einsum('bqk,bkd->bqd', self_attn_w.astype(jnp.bfloat16), dec_bf,
                      preferred_element_type=jnp.float32) + dec
    dec2 = _layernorm(dec2, g2_ref[...], b2_ref[...])

    # --- final dense; batch folded into M ---
    dec2_flat = dec2.reshape(TB * Lo, H).astype(jnp.bfloat16)
    logits = (jnp.dot(dec2_flat, wf_ref[...], preferred_element_type=jnp.float32)
              + bf_ref[...])                            # (TB*Lo, Vout) f32

    logits_ref[...] = logits.reshape(TB, Lo, Vout).astype(logits_ref.dtype)
    attn_ref[...] = attn_w.astype(attn_ref.dtype)
    sattn_ref[...] = self_attn_w.astype(sattn_ref.dtype)


def _pick_block_batch(batch, len_out, target_rows=256):
    """Largest divisor of `batch` with tb*len_out <= target_rows.

    Amortizes per-grid-step overhead and fills the MXU M dim.  The batch tile
    is always the third-to-last block dim, so any divisor is layout-legal.
    For large batches this still yields a grid length > 1, so both v7x
    TensorCores get work via dimension_semantics=("parallel",).
    """
    cap = max(1, target_rows // max(len_out, 1))
    best = 1
    for tb in range(1, batch + 1):
        if batch % tb == 0 and tb <= cap:
            best = tb
    return best


@jax.jit
def positional_attention_forward(x, params):
    """x: (B, len_in, vocab_in) f32.  Returns (logits, attn_w, self_attn_w)."""
    B, Li, Vin = x.shape
    Lo, H = params["query"].shape
    Vout = params["wf"].shape[1]

    TB = _pick_block_batch(B, Lo)
    grid = (B // TB,)

    # Pre-fold the key-dense bias into the positional embedding and pre-cast
    # the weight matrices to bf16 (halves their DMA bytes; f32 accumulation
    # is kept inside the kernel).
    bias_pos = params["bk"] + params["pos"]             # (Li, H) f32
    wk_bf = params["wk"].astype(jnp.bfloat16)
    wf_bf = params["wf"].astype(jnp.bfloat16)

    full = lambda shape: pl.BlockSpec(shape, lambda b: tuple(0 for _ in shape))

    out_shapes = (
        jax.ShapeDtypeStruct((B, Lo, Vout), jnp.float32),
        jax.ShapeDtypeStruct((B, Lo, Li), jnp.float32),
        jax.ShapeDtypeStruct((B, Lo, Lo), jnp.float32),
    )

    flops = 2 * B * (Li * Vin * H + 2 * Lo * Li * H + 2 * Lo * Lo * H
                     + Lo * H * Vout)
    transcendentals = B * Lo * (Li + Lo)
    bytes_accessed = int(
        4 * x.size                                   # input activations
        + 2 * (wk_bf.size + wf_bf.size)              # bf16 weights
        + 4 * (bias_pos.size + params["query"].size + 4 * H + Vout)
        + 4 * B * Lo * (Vout + Li + Lo)              # outputs
    )
    cost = pl.CostEstimate(flops=flops, transcendentals=transcendentals,
                           bytes_accessed=bytes_accessed)

    return pl.pallas_call(
        _pos_attn_kernel,
        out_shape=out_shapes,
        grid=grid,
        in_specs=[
            pl.BlockSpec((TB, Li, Vin), lambda b: (b, 0, 0)),  # x
            full((Vin, H)),    # wk (bf16)
            full((Li, H)),     # bias + positional_emb
            full((Lo, H)),     # query
            full((1, H)),      # layer_norm gamma
            full((1, H)),      # layer_norm beta
            full((1, H)),      # layer_norm_self gamma
            full((1, H)),      # layer_norm_self beta
            full((H, Vout)),   # wf (bf16)
            full((1, Vout)),   # bf
        ],
        out_specs=(
            pl.BlockSpec((TB, Lo, Vout), lambda b: (b, 0, 0)),
            pl.BlockSpec((TB, Lo, Li), lambda b: (b, 0, 0)),
            pl.BlockSpec((TB, Lo, Lo), lambda b: (b, 0, 0)),
        ),
        compiler_params=pltpu.CompilerParams(
            dimension_semantics=("parallel",)),
        cost_estimate=cost,
    )(
        x, wk_bf, bias_pos, params["query"],
        params["g1"], params["b1"], params["g2"], params["b2"],
        wf_bf, params["bf"],
    )


def positional_attention_reference(x, params):
    """Pure-JAX f32 reference (mirrors the PyTorch module exactly)."""
    H = params["query"].shape[1]
    inv_scale = 1.0 / math.sqrt(H)

    def attn(q, k, v):
        s = jnp.einsum('bqd,bkd->bqk', q, k) * inv_scale
        w = jax.nn.softmax(s, axis=-1)
        return jnp.einsum('bqk,bkd->bqd', w, v) + q, w

    kv = jnp.einsum('bld,dh->blh', x, params["wk"]) + params["bk"] + params["pos"]
    q = jnp.broadcast_to(params["query"], (x.shape[0],) + params["query"].shape)
    dec, attn_w = attn(q, kv, kv)
    dec = _layernorm(dec, params["g1"], params["b1"])
    dec2, self_attn_w = attn(dec, dec, dec)
    dec2 = _layernorm(dec2, params["g2"], params["b2"])
    logits = jnp.einsum('blh,hv->blv', dec2, params["wf"]) + params["bf"]
    return logits, attn_w, self_attn_w


def init_params(key, *, len_in, len_out, vocab_in, vocab_out, hidden):
    # Deterministic synthetic parameters (the PyTorch module zero-inits the
    # query / positional embedding; we use small random values so the kernel
    # exercises a non-trivial path).
    ks = jax.random.split(key, 6)
    scale = 0.1
    return {
        "query": scale * jax.random.normal(ks[0], (len_out, hidden), jnp.float32),
        "pos": scale * jax.random.normal(ks[1], (len_in, hidden), jnp.float32),
        "wk": scale * jax.random.normal(ks[2], (vocab_in, hidden), jnp.float32),
        "bk": scale * jax.random.normal(ks[3], (1, hidden), jnp.float32),
        "g1": jnp.ones((1, hidden), jnp.float32),
        "b1": jnp.zeros((1, hidden), jnp.float32),
        "g2": jnp.ones((1, hidden), jnp.float32),
        "b2": jnp.zeros((1, hidden), jnp.float32),
        "wf": scale * jax.random.normal(ks[4], (hidden, vocab_out), jnp.float32),
        "bf": scale * jax.random.normal(ks[5], (1, vocab_out), jnp.float32),
    }


if __name__ == "__main__":
    B, Li, Lo = 2, 8, 8
    Vin, Vout, H = 16, 12, 32

    key = jax.random.PRNGKey(0)
    k_x, k_p = jax.random.split(key)
    x = jax.random.normal(k_x, (B, Li, Vin), jnp.float32)
    params = init_params(k_p, len_in=Li, len_out=Lo, vocab_in=Vin,
                         vocab_out=Vout, hidden=H)

    logits, attn_w, self_attn_w = positional_attention_forward(x, params)
    jax.block_until_ready((logits, attn_w, self_attn_w))

    assert logits.shape == (B, Lo, Vout)
    assert attn_w.shape == (B, Lo, Li)
    assert self_attn_w.shape == (B, Lo, Lo)

    # Sanity: finite outputs, softmax rows ~ 1 (approx reciprocal in kernel).
    assert bool(jnp.all(jnp.isfinite(logits)))
    assert bool(jnp.allclose(jnp.sum(attn_w, axis=-1), 1.0, atol=1e-2))
    assert bool(jnp.allclose(jnp.sum(self_attn_w, axis=-1), 1.0, atol=1e-2))

    # Numeric check against the f32 reference (loose: bf16 MXU accumulation).
    ref_logits, ref_attn, ref_sattn = positional_attention_reference(x, params)
    assert bool(jnp.allclose(logits, ref_logits, atol=0.1, rtol=0.1))
    assert bool(jnp.allclose(attn_w, ref_attn, atol=0.05, rtol=0.1))
    assert bool(jnp.allclose(self_attn_w, ref_sattn, atol=0.05, rtol=0.1))

    print("KERNEL_OK")
</pallas_src>

<mosaic_0001>
module attributes {stable_mosaic.version = 11 : i64} {
  func.func @_pos_attn_kernel(%arg0: i32, %arg1: memref<2x8x16xf32, #tpu.memory_space<vmem>>, %arg2: memref<16x32xbf16, #tpu.memory_space<vmem>>, %arg3: memref<8x32xf32, #tpu.memory_space<vmem>>, %arg4: memref<8x32xf32, #tpu.memory_space<vmem>>, %arg5: memref<1x32xf32, #tpu.memory_space<vmem>>, %arg6: memref<1x32xf32, #tpu.memory_space<vmem>>, %arg7: memref<1x32xf32, #tpu.memory_space<vmem>>, %arg8: memref<1x32xf32, #tpu.memory_space<vmem>>, %arg9: memref<32x12xbf16, #tpu.memory_space<vmem>>, %arg10: memref<1x12xf32, #tpu.memory_space<vmem>>, %arg11: memref<2x8x12xf32, #tpu.memory_space<vmem>>, %arg12: memref<2x8x8xf32, #tpu.memory_space<vmem>>, %arg13: memref<2x8x8xf32, #tpu.memory_space<vmem>>) attributes {dimension_semantics = [#tpu.dimension_semantics<parallel>], iteration_bounds = array<i64: 1>, scalar_prefetch = 0 : i64, scratch_operands = 0 : i64, tpu.core_type = #tpu.core_type<tc>, window_params = [{transform_indices = @transform_0, window_bounds = array<i64: 2, 8, 16>}, {pipeline_mode = #tpu.pipeline_mode<synchronous>, transform_indices = @transform_1, window_bounds = array<i64: 16, 32>}, {pipeline_mode = #tpu.pipeline_mode<synchronous>, transform_indices = @transform_2, window_bounds = array<i64: 8, 32>}, {pipeline_mode = #tpu.pipeline_mode<synchronous>, transform_indices = @transform_3, window_bounds = array<i64: 8, 32>}, {pipeline_mode = #tpu.pipeline_mode<synchronous>, transform_indices = @transform_4, window_bounds = array<i64: 1, 32>}, {pipeline_mode = #tpu.pipeline_mode<synchronous>, transform_indices = @transform_5, window_bounds = array<i64: 1, 32>}, {pipeline_mode = #tpu.pipeline_mode<synchronous>, transform_indices = @transform_6, window_bounds = array<i64: 1, 32>}, {pipeline_mode = #tpu.pipeline_mode<synchronous>, transform_indices = @transform_7, window_bounds = array<i64: 1, 32>}, {pipeline_mode = #tpu.pipeline_mode<synchronous>, transform_indices = @transform_8, window_bounds = array<i64: 32, 12>}, {pipeline_mode = #tpu.pipeline_mode<synchronous>, transform_indices = @transform_9, window_bounds = array<i64: 1, 12>}, {transform_indices = @transform_10, window_bounds = array<i64: 2, 8, 12>}, {transform_indices = @transform_11, window_bounds = array<i64: 2, 8, 8>}, {transform_indices = @transform_12, window_bounds = array<i64: 2, 8, 8>}]} {
    %c0 = arith.constant 0 : index
    %c0_0 = arith.constant 0 : index
    %c0_1 = arith.constant 0 : index
    %0 = vector.load %arg1[%c0, %c0_0, %c0_1] : memref<2x8x16xf32, #tpu.memory_space<vmem>>, vector<2x8x16xf32>
    %1 = vector.shape_cast %0 : vector<2x8x16xf32> to vector<16x16xf32>
    %2 = arith.truncf %1 : vector<16x16xf32> to vector<16x16xbf16>
    %c0_2 = arith.constant 0 : index
    %c0_3 = arith.constant 0 : index
    %3 = vector.load %arg2[%c0_2, %c0_3] : memref<16x32xbf16, #tpu.memory_space<vmem>>, vector<16x32xbf16>
    %cst = arith.constant dense<0.000000e+00> : vector<16x32xf32>
    %4 = tpu.matmul %2, %3, %cst {dimension_numbers = #tpu.dot_dimension_numbers<[1], [0], [0], [1], [0, 0, 1, 1], [], []>} : vector<16x16xbf16>, vector<16x32xbf16>, vector<16x32xf32> -> vector<16x32xf32>
    %5 = vector.shape_cast %4 : vector<16x32xf32> to vector<2x8x32xf32>
    %c0_4 = arith.constant 0 : index
    %c0_5 = arith.constant 0 : index
    %6 = vector.load %arg3[%c0_4, %c0_5] : memref<8x32xf32, #tpu.memory_space<vmem>>, vector<8x32xf32>
    %7 = vector.shape_cast %6 : vector<8x32xf32> to vector<1x8x32xf32>
    %8 = vector.broadcast %7 : vector<1x8x32xf32> to vector<2x8x32xf32>
    %9 = arith.addf %5, %8 : vector<2x8x32xf32>
    %10 = arith.truncf %9 : vector<2x8x32xf32> to vector<2x8x32xbf16>
    %c0_6 = arith.constant 0 : index
    %c0_7 = arith.constant 0 : index
    %11 = vector.load %arg4[%c0_6, %c0_7] : memref<8x32xf32, #tpu.memory_space<vmem>>, vector<8x32xf32>
    %cst_8 = arith.constant 0.176776692 : f32
    %12 = vector.broadcast %cst_8 : f32 to vector<8x32xf32>
    %13 = arith.mulf %11, %12 : vector<8x32xf32>
    %14 = vector.shape_cast %13 : vector<8x32xf32> to vector<1x8x32xf32>
    %15 = vector.broadcast %14 : vector<1x8x32xf32> to vector<2x8x32xf32>
    %16 = arith.truncf %15 : vector<2x8x32xf32> to vector<2x8x32xbf16>
    "tpu.trace_start"() <{level = 10 : i32, message = "bqd,bkd->bqk"}> : () -> ()
    %cst_9 = arith.constant dense<0.000000e+00> : vector<2x8x8xf32>
    %17 = tpu.matmul %16, %10, %cst_9 {dimension_numbers = #tpu.dot_dimension_numbers<[2], [2], [1], [1], [0, 0, 0, 1, 1, 1], [0], [0]>} : vector<2x8x32xbf16>, vector<2x8x32xbf16>, vector<2x8x8xf32> -> vector<2x8x8xf32>
    "tpu.trace_stop"() : () -> ()
    %cst_10 = arith.constant dense<0xFF800000> : vector<2x8xf32>
    %18 = vector.multi_reduction <maximumf>, %17, %cst_10 [2] : vector<2x8x8xf32> to vector<2x8xf32>
    %19 = vector.shape_cast %18 : vector<2x8xf32> to vector<2x8x1xf32>
    %20 = vector.broadcast %19 : vector<2x8x1xf32> to vector<2x8x8xf32>
    %21 = arith.subf %17, %20 : vector<2x8x8xf32>
    %22 = math.exp %21 : vector<2x8x8xf32>
    %cst_11 = arith.constant dense<0.000000e+00> : vector<2x8xf32>
    %23 = vector.multi_reduction <add>, %22, %cst_11 [2] : vector<2x8x8xf32> to vector<2x8xf32>
    %24 = vector.shape_cast %23 : vector<2x8xf32> to vector<2x8x1xf32>
    %25 = tpu.reciprocal %24 {approx = true} : vector<2x8x1xf32> -> vector<2x8x1xf32>
    %26 = vector.broadcast %25 : vector<2x8x1xf32> to vector<2x8x8xf32>
    %27 = arith.mulf %22, %26 : vector<2x8x8xf32>
    %28 = arith.truncf %27 : vector<2x8x8xf32> to vector<2x8x8xbf16>
    "tpu.trace_start"() <{level = 10 : i32, message = "bqk,bkd->bqd"}> : () -> ()
    %cst_12 = arith.constant dense<0.000000e+00> : vector<2x8x32xf32>
    %29 = tpu.matmul %28, %10, %cst_12 {dimension_numbers = #tpu.dot_dimension_numbers<[2], [1], [1], [2], [0, 0, 0, 1, 1, 2], [0], [0]>} : vector<2x8x8xbf16>, vector<2x8x32xbf16>, vector<2x8x32xf32> -> vector<2x8x32xf32>
    "tpu.trace_stop"() : () -> ()
    %30 = vector.shape_cast %11 : vector<8x32xf32> to vector<1x8x32xf32>
    %31 = vector.broadcast %30 : vector<1x8x32xf32> to vector<2x8x32xf32>
    %32 = arith.addf %29, %31 : vector<2x8x32xf32>
    %c0_13 = arith.constant 0 : index
    %c0_14 = arith.constant 0 : index
    %33 = vector.load %arg5[%c0_13, %c0_14] : memref<1x32xf32, #tpu.memory_space<vmem>>, vector<1x32xf32>
    %c0_15 = arith.constant 0 : index
    %c0_16 = arith.constant 0 : index
    %34 = vector.load %arg6[%c0_15, %c0_16] : memref<1x32xf32, #tpu.memory_space<vmem>>, vector<1x32xf32>
    %cst_17 = arith.constant dense<0.000000e+00> : vector<2x8xf32>
    %35 = vector.multi_reduction <add>, %32, %cst_17 [2] : vector<2x8x32xf32> to vector<2x8xf32>
    %36 = vector.shape_cast %35 : vector<2x8xf32> to vector<2x8x1xf32>
    %cst_18 = arith.constant 3.200000e+01 : f32
    %37 = vector.broadcast %cst_18 : f32 to vector<2x8x1xf32>
    %38 = arith.divf %36, %37 : vector<2x8x1xf32>
    %39 = vector.broadcast %38 : vector<2x8x1xf32> to vector<2x8x32xf32>
    %40 = arith.subf %32, %39 : vector<2x8x32xf32>
    %41 = arith.mulf %40, %40 : vector<2x8x32xf32>
    %cst_19 = arith.constant dense<0.000000e+00> : vector<2x8xf32>
    %42 = vector.multi_reduction <add>, %41, %cst_19 [2] : vector<2x8x32xf32> to vector<2x8xf32>
    %43 = vector.shape_cast %42 : vector<2x8xf32> to vector<2x8x1xf32>
    %cst_20 = arith.constant 3.200000e+01 : f32
    %44 = vector.broadcast %cst_20 : f32 to vector<2x8x1xf32>
    %45 = arith.divf %43, %44 : vector<2x8x1xf32>
    %46 = vector.broadcast %38 : vector<2x8x1xf32> to vector<2x8x32xf32>
    %47 = arith.subf %32, %46 : vector<2x8x32xf32>
    %cst_21 = arith.constant 9.99999974E-6 : f32
    %48 = vector.broadcast %cst_21 : f32 to vector<2x8x1xf32>
    %49 = arith.addf %45, %48 : vector<2x8x1xf32>
    %50 = math.rsqrt %49 : vector<2x8x1xf32>
    %51 = vector.broadcast %50 : vector<2x8x1xf32> to vector<2x8x32xf32>
    %52 = arith.mulf %47, %51 : vector<2x8x32xf32>
    %53 = vector.shape_cast %33 : vector<1x32xf32> to vector<1x1x32xf32>
    %54 = vector.broadcast %53 : vector<1x1x32xf32> to vector<2x8x32xf32>
    %55 = arith.mulf %52, %54 : vector<2x8x32xf32>
    %56 = vector.shape_cast %34 : vector<1x32xf32> to vector<1x1x32xf32>
    %57 = vector.broadcast %56 : vector<1x1x32xf32> to vector<2x8x32xf32>
    %58 = arith.addf %55, %57 : vector<2x8x32xf32>
    %59 = arith.truncf %58 : vector<2x8x32xf32> to vector<2x8x32xbf16>
    "tpu.trace_start"() <{level = 10 : i32, message = "bqd,bkd->bqk"}> : () -> ()
    %cst_22 = arith.constant dense<0.000000e+00> : vector<2x8x8xf32>
    %60 = tpu.matmul %59, %59, %cst_22 {dimension_numbers = #tpu.dot_dimension_numbers<[2], [2], [1], [1], [0, 0, 0, 1, 1, 1], [0], [0]>} : vector<2x8x32xbf16>, vector<2x8x32xbf16>, vector<2x8x8xf32> -> vector<2x8x8xf32>
    "tpu.trace_stop"() : () -> ()
    %cst_23 = arith.constant 0.176776692 : f32
    %61 = vector.broadcast %cst_23 : f32 to vector<2x8x8xf32>
    %62 = arith.mulf %60, %61 : vector<2x8x8xf32>
    %cst_24 = arith.constant dense<0xFF800000> : vector<2x8xf32>
    %63 = vector.multi_reduction <maximumf>, %62, %cst_24 [2] : vector<2x8x8xf32> to vector<2x8xf32>
    %64 = vector.shape_cast %63 : vector<2x8xf32> to vector<2x8x1xf32>
    %65 = vector.broadcast %64 : vector<2x8x1xf32> to vector<2x8x8xf32>
    %66 = arith.subf %62, %65 : vector<2x8x8xf32>
    %67 = math.exp %66 : vector<2x8x8xf32>
    %cst_25 = arith.constant dense<0.000000e+00> : vector<2x8xf32>
    %68 = vector.multi_reduction <add>, %67, %cst_25 [2] : vector<2x8x8xf32> to vector<2x8xf32>
    %69 = vector.shape_cast %68 : vector<2x8xf32> to vector<2x8x1xf32>
    %70 = tpu.reciprocal %69 {approx = true} : vector<2x8x1xf32> -> vector<2x8x1xf32>
    %71 = vector.broadcast %70 : vector<2x8x1xf32> to vector<2x8x8xf32>
    %72 = arith.mulf %67, %71 : vector<2x8x8xf32>
    %73 = arith.truncf %72 : vector<2x8x8xf32> to vector<2x8x8xbf16>
    "tpu.trace_start"() <{level = 10 : i32, message = "bqk,bkd->bqd"}> : () -> ()
    %cst_26 = arith.constant dense<0.000000e+00> : vector<2x8x32xf32>
    %74 = tpu.matmul %73, %59, %cst_26 {dimension_numbers = #tpu.dot_dimension_numbers<[2], [1], [1], [2], [0, 0, 0, 1, 1, 2], [0], [0]>} : vector<2x8x8xbf16>, vector<2x8x32xbf16>, vector<2x8x32xf32> -> vector<2x8x32xf32>
    "tpu.trace_stop"() : () -> ()
    %75 = arith.addf %74, %58 : vector<2x8x32xf32>
    %c0_27 = arith.constant 0 : index
    %c0_28 = arith.constant 0 : index
    %76 = vector.load %arg7[%c0_27, %c0_28] : memref<1x32xf32, #tpu.memory_space<vmem>>, vector<1x32xf32>
    %c0_29 = arith.constant 0 : index
    %c0_30 = arith.constant 0 : index
    %77 = vector.load %arg8[%c0_29, %c0_30] : memref<1x32xf32, #tpu.memory_space<vmem>>, vector<1x32xf32>
    %cst_31 = arith.constant dense<0.000000e+00> : vector<2x8xf32>
    %78 = vector.multi_reduction <add>, %75, %cst_31 [2] : vector<2x8x32xf32> to vector<2x8xf32>
    %79 = vector.shape_cast %78 : vector<2x8xf32> to vector<2x8x1xf32>
    %cst_32 = arith.constant 3.200000e+01 : f32
    %80 = vector.broadcast %cst_32 : f32 to vector<2x8x1xf32>
    %81 = arith.divf %79, %80 : vector<2x8x1xf32>
    %82 = vector.broadcast %81 : vector<2x8x1xf32> to vector<2x8x32xf32>
    %83 = arith.subf %75, %82 : vector<2x8x32xf32>
    %84 = arith.mulf %83, %83 : vector<2x8x32xf32>
    %cst_33 = arith.constant dense<0.000000e+00> : vector<2x8xf32>
    %85 = vector.multi_reduction <add>, %84, %cst_33 [2] : vector<2x8x32xf32> to vector<2x8xf32>
    %86 = vector.shape_cast %85 : vector<2x8xf32> to vector<2x8x1xf32>
    %cst_34 = arith.constant 3.200000e+01 : f32
    %87 = vector.broadcast %cst_34 : f32 to vector<2x8x1xf32>
    %88 = arith.divf %86, %87 : vector<2x8x1xf32>
    %89 = vector.broadcast %81 : vector<2x8x1xf32> to vector<2x8x32xf32>
    %90 = arith.subf %75, %89 : vector<2x8x32xf32>
    %cst_35 = arith.constant 9.99999974E-6 : f32
    %91 = vector.broadcast %cst_35 : f32 to vector<2x8x1xf32>
    %92 = arith.addf %88, %91 : vector<2x8x1xf32>
    %93 = math.rsqrt %92 : vector<2x8x1xf32>
    %94 = vector.broadcast %93 : vector<2x8x1xf32> to vector<2x8x32xf32>
    %95 = arith.mulf %90, %94 : vector<2x8x32xf32>
    %96 = vector.shape_cast %76 : vector<1x32xf32> to vector<1x1x32xf32>
    %97 = vector.broadcast %96 : vector<1x1x32xf32> to vector<2x8x32xf32>
    %98 = arith.mulf %95, %97 : vector<2x8x32xf32>
    %99 = vector.shape_cast %77 : vector<1x32xf32> to vector<1x1x32xf32>
    %100 = vector.broadcast %99 : vector<1x1x32xf32> to vector<2x8x32xf32>
    %101 = arith.addf %98, %100 : vector<2x8x32xf32>
    %102 = vector.shape_cast %101 : vector<2x8x32xf32> to vector<16x32xf32>
    %103 = arith.truncf %102 : vector<16x32xf32> to vector<16x32xbf16>
    %c0_36 = arith.constant 0 : index
    %c0_37 = arith.constant 0 : index
    %104 = vector.load %arg9[%c0_36, %c0_37] : memref<32x12xbf16, #tpu.memory_space<vmem>>, vector<32x12xbf16>
    %cst_38 = arith.constant dense<0.000000e+00> : vector<16x12xf32>
    %105 = tpu.matmul %103, %104, %cst_38 {dimension_numbers = #tpu.dot_dimension_numbers<[1], [0], [0], [1], [0, 0, 1, 1], [], []>} : vector<16x32xbf16>, vector<32x12xbf16>, vector<16x12xf32> -> vector<16x12xf32>
    %c0_39 = arith.constant 0 : index
    %c0_40 = arith.constant 0 : index
    %106 = vector.load %arg10[%c0_39, %c0_40] : memref<1x12xf32, #tpu.memory_space<vmem>>, vector<1x12xf32>
    %107 = vector.broadcast %106 : vector<1x12xf32> to vector<16x12xf32>
    %108 = arith.addf %105, %107 : vector<16x12xf32>
    %109 = vector.shape_cast %108 : vector<16x12xf32> to vector<2x8x12xf32>
    %c0_41 = arith.constant 0 : index
    %c0_42 = arith.constant 0 : index
    %c0_43 = arith.constant 0 : index
    %110 = vector.load %arg11[%c0_41, %c0_42, %c0_43] : memref<2x8x12xf32, #tpu.memory_space<vmem>>, vector<2x8x12xf32>
    tpu.vector_store %arg11[%c0_41, %c0_42, %c0_43], %109 {strides = array<i32>} : memref<2x8x12xf32, #tpu.memory_space<vmem>>, vector<2x8x12xf32>,
    %c0_44 = arith.constant 0 : index
    %c0_45 = arith.constant 0 : index
    %c0_46 = arith.constant 0 : index
    %111 = vector.load %arg12[%c0_44, %c0_45, %c0_46] : memref<2x8x8xf32, #tpu.memory_space<vmem>>, vector<2x8x8xf32>
    tpu.vector_store %arg12[%c0_44, %c0_45, %c0_46], %27 {strides = array<i32>} : memref<2x8x8xf32, #tpu.memory_space<vmem>>, vector<2x8x8xf32>,
    %c0_47 = arith.constant 0 : index
    %c0_48 = arith.constant 0 : index
    %c0_49 = arith.constant 0 : index
    %112 = vector.load %arg13[%c0_47, %c0_48, %c0_49] : memref<2x8x8xf32, #tpu.memory_space<vmem>>, vector<2x8x8xf32>
    tpu.vector_store %arg13[%c0_47, %c0_48, %c0_49], %72 {strides = array<i32>} : memref<2x8x8xf32, #tpu.memory_space<vmem>>, vector<2x8x8xf32>,
    return
  }
  func.func @transform_0(%arg0: i32) -> (i32, i32, i32) {
    %c0_i32 = arith.constant 0 : i32
    %c0_i32_0 = arith.constant 0 : i32
    %c0_i32_1 = arith.constant 0 : i32
    return %arg0, %c0_i32, %c0_i32_0 : i32, i32, i32
  }
  func.func @transform_1(%arg0: i32) -> (i32, i32) {
    %c0_i32 = arith.constant 0 : i32
    %c0_i32_0 = arith.constant 0 : i32
    %c0_i32_1 = arith.constant 0 : i32
    return %c0_i32, %c0_i32_0 : i32, i32
  }
  func.func @transform_2(%arg0: i32) -> (i32, i32) {
    %c0_i32 = arith.constant 0 : i32
    %c0_i32_0 = arith.constant 0 : i32
    %c0_i32_1 = arith.constant 0 : i32
    return %c0_i32, %c0_i32_0 : i32, i32
  }
  func.func @transform_3(%arg0: i32) -> (i32, i32) {
    %c0_i32 = arith.constant 0 : i32
    %c0_i32_0 = arith.constant 0 : i32
    %c0_i32_1 = arith.constant 0 : i32
    return %c0_i32, %c0_i32_0 : i32, i32
  }
  func.func @transform_4(%arg0: i32) -> (i32, i32) {
    %c0_i32 = arith.constant 0 : i32
    %c0_i32_0 = arith.constant 0 : i32
    %c0_i32_1 = arith.constant 0 : i32
    return %c0_i32, %c0_i32_0 : i32, i32
  }
  func.func @transform_5(%arg0: i32) -> (i32, i32) {
    %c0_i32 = arith.constant 0 : i32
    %c0_i32_0 = arith.constant 0 : i32
    %c0_i32_1 = arith.constant 0 : i32
    return %c0_i32, %c0_i32_0 : i32, i32
  }
  func.func @transform_6(%arg0: i32) -> (i32, i32) {
    %c0_i32 = arith.constant 0 : i32
    %c0_i32_0 = arith.constant 0 : i32
    %c0_i32_1 = arith.constant 0 : i32
    return %c0_i32, %c0_i32_0 : i32, i32
  }
  func.func @transform_7(%arg0: i32) -> (i32, i32) {
    %c0_i32 = arith.constant 0 : i32
    %c0_i32_0 = arith.constant 0 : i32
    %c0_i32_1 = arith.constant 0 : i32
    return %c0_i32, %c0_i32_0 : i32, i32
  }
  func.func @transform_8(%arg0: i32) -> (i32, i32) {
    %c0_i32 = arith.constant 0 : i32
    %c0_i32_0 = arith.constant 0 : i32
    %c0_i32_1 = arith.constant 0 : i32
    return %c0_i32, %c0_i32_0 : i32, i32
  }
  func.func @transform_9(%arg0: i32) -> (i32, i32) {
    %c0_i32 = arith.constant 0 : i32
    %c0_i32_0 = arith.constant 0 : i32
    %c0_i32_1 = arith.constant 0 : i32
    return %c0_i32, %c0_i32_0 : i32, i32
  }
  func.func @transform_10(%arg0: i32) -> (i32, i32, i32) {
    %c0_i32 = arith.constant 0 : i32
    %c0_i32_0 = arith.constant 0 : i32
    %c0_i32_1 = arith.constant 0 : i32
    return %arg0, %c0_i32, %c0_i32_0 : i32, i32, i32
  }
  func.func @transform_11(%arg0: i32) -> (i32, i32, i32) {
    %c0_i32 = arith.constant 0 : i32
    %c0_i32_0 = arith.constant 0 : i32
    %c0_i32_1 = arith.constant 0 : i32
    return %arg0, %c0_i32, %c0_i32_0 : i32, i32, i32
  }
  func.func @transform_12(%arg0: i32) -> (i32, i32, i32) {
    %c0_i32 = arith.constant 0 : i32
    %c0_i32_0 = arith.constant 0 : i32
    %c0_i32_1 = arith.constant 0 : i32
    return %arg0, %c0_i32, %c0_i32_0 : i32, i32, i32
  }
}

</mosaic_0001>

<bundles_post_ra>
// kernel: positional_attention_forward.1
= control target key start
LH: loop header
LB: loop body
LE: loop exit
PB: predicated region body
PF: predicated region fallthrough
CT: control target
= control target key end

     0   :  { %18 = vsyncpa [#allocation3], 0  ;;  %v925_v1 = vmov 0.0   ;;  %vm52_vm0 = vcmask 130048   ;;  %vm926_vm1 = vmmov 0   ;;  %s1134_s0 = inlined_call_operand.vmem [shape: f32[2,8,16], index: 0, kind: input, shape index: {}]   ;;  %s1135_s1 = inlined_call_operand.vmem [shape: bf16[16,32], index: 1, kind: input, shape index: {}]   ;;  %s1136_s2 = inlined_call_operand.vmem [shape: f32[8,32], index: 2, kind: input, shape index: {}]   ;;  %s1137_s3 = inlined_call_operand.vmem [shape: f32[8,32], index: 3, kind: input, shape index: {}]   ;;  %s1138_s4 = inlined_call_operand.vmem [shape: f32[1,32], index: 4, kind: input, shape index: {}]   ;;  %s1139_s5 = inlined_call_operand.vmem [shape: f32[1,32], index: 5, kind: input, shape index: {}]   ;;  %s1140_s6 = inlined_call_operand.vmem [shape: f32[1,32], index: 6, kind: input, shape index: {}]   ;;  %s1141_s7 = inlined_call_operand.vmem [shape: f32[1,32], index: 7, kind: input, shape index: {}]   ;;  %s1142_s8 = inlined_call_operand.vmem [shape: bf16[32,12], index: 8, kind: input, shape index: {}]   ;;  %s1143_s9 = inlined_call_operand.vmem [shape: f32[1,12], index: 9, kind: input, shape index: {}]   ;;  %s1144_s10 = inlined_call_operand.hbm [shape: f32[2,8,12], index: 10, kind: output, shape index: {0}]   ;;  %s1145_s11 = inlined_call_operand.hbm [shape: f32[2,8,8], index: 11, kind: output, shape index: {1}]   ;;  %s1146_s12 = inlined_call_operand.hbm [shape: f32[2,8,8], index: 12, kind: output, shape index: {2}]  }
   0x1   :  { %v834_v0 = vld [vmem:[%s1135_s1] sm:$0xff]   ;;  %765 = vmatprep.subr.bf16.mxu0 %v925_v1  ;;  %v42_v3 = vld [vmem:[%s1134_s0 + $0x8] sm:$0xff]  ;;  %771 = vmatprep.subr.bf16.mxu1 %v925_v1 }
   0x2   :  { %v41_v2 = vld [vmem:[%s1134_s0] sm:$0xff]  ;;  %766 = vmatpush3.bf16.msra.mxu0 %v834_v0  ;;  %767 = vmatprep.mubr.msk.bf16.mxu0 %vm926_vm1, %v925_v1 }
   0x3   :  { %v43_v4 = vpack.c.bf16 %v42_v3, %v41_v2  ;;  %777 = vmatprep.subr.bf16.mxu0 %v925_v1  ;;  %773 = vmatprep.mubr.msk.bf16.mxu1 %vm926_vm1, %v925_v1 }
   0x4   :  { %19 = vsyncpa [#allocation5], 0  ;;  %v97_v5 = vld [vmem:[%s1136_s2] sm:$0xff]  ;;  %vm105_vm2 = vcmask 261120   ;;  %vm223_vm3 = vcmask 1043456   ;;  %vm195_vm4 = vcmask 64512  }
   0x5   :  { %768 = vmatmul.mubr.msk.bf16.vlgmr.msra.gmra.mxu0 %vm52_vm0, %v43_v4  ;;  %v1021_v9 = vld [vmem:[%s1137_s3] sm:$0xff]  ;;  %s927_s18 = smov [#allocation4]  }
   0x6   :  { %779 = vmatprep.mubr.msk.bf16.mxu0 %vm926_vm1, %v925_v1  ;;  %v103_v14 = vmul.f32 0.17677669, %v1021_v9  ;;  %s696_s19 = sshll.u32 %s927_s18, 4  ;;  %s697_s19 = int_to_ptr.vmem [resolvable:$true] %s696_s19 }
   0x7   :  { %s861_s20 = scalar_lea.vmem %s697_s19, 256  ;;  %p866_p1 = scmp.lt.s32.totalorder %s697_s19, %s697_s19 }
   0x8   :  { %v104_v18 = vpack.c.bf16 %v103_v14, %v103_v14  ;;  %p862_p0 = scmp.ne.s32.totalorder %s697_s19, %s861_s20  ;;  %p867_p2 = scmp.lt.s32.totalorder %s861_s20, %s861_s20 }
   0xa   :  { %p868_p3 = por %p867_p2, %p866_p1 }
   0xc   :  { %p869_p4 = pnand %p868_p3, %p862_p0 }
  0xc5   :  { %v90_v6 = vpop.f32.mrf.mxu0 }
  0xc6   :  { %v98_v7 = vadd.f32 %v97_v5, %v90_v6 }
  0xc7   :  { %v769_v8 = vpop.f32.mrf.mxu0 }
  0xc8   :  { %v100_v10 = vpack.c.bf16 %v98_v7, %v98_v7 }
  0xc9   :  { %v93_v11 = vpop.f32.mrf.mxu0 }
  0xca   :  { %v99_v12 = vadd.f32 %v97_v5, %v93_v11  ;;  %v110_v13 = vsel %vm105_vm2, %v100_v10, 0  ;;  %v224_v19 = vsel %vm223_vm3, %v100_v10, 0 }
  0xcb   :  { %v770_v15 = vpop.f32.mrf.mxu0  ;;  %772 = vmatpush3.bf16.xpose.msra.mxu1 %v110_v13 }
  0xcc   :  { %v101_v16 = vpack.c.bf16 %v99_v12, %v99_v12  ;;  %783 = vmatprep.subr.bf16.mxu1 %v925_v1  ;;  %v732_v15 = vld [vmem:[%s1138_s4] ss:$0 sm:$0xff] }
  0xce   :  { %v153_v17 = vsel %vm105_vm2, %v101_v16, 0  ;;  %v269_v20 = vsel %vm223_vm3, %v101_v16, 0 }
  0xcf   :  { %778 = vmatpush3.bf16.xpose.msra.mxu0 %v153_v17  ;;  %v733_v17 = vld [vmem:[%s1139_s5] ss:$0 sm:$0xff] }
  0xd0   :  { %789 = vmatprep.subr.bf16.mxu0 %v925_v1 }
  0xd2   :  { %774 = vmatmul.mubr.msk.bf16.vlgmr.msra.gmra.mxu1 %vm105_vm2, %v104_v18 }
  0xd3   :  { %784 = vmatpush3.bf16.msra.mxu1 %v224_v19  ;;  %785 = vmatprep.mubr.msk.bf16.mxu1 %vm926_vm1, %v925_v1 }
  0xd4   :  { %795 = vmatprep.subr.bf16.mxu1 %v925_v1 }
  0xd6   :  { %780 = vmatmul.mubr.msk.bf16.vlgmr.msra.gmra.mxu0 %vm105_vm2, %v104_v18 }
  0xd7   :  { %790 = vmatpush3.bf16.msra.mxu0 %v269_v20  ;;  %791 = vmatprep.mubr.msk.bf16.mxu0 %vm926_vm1, %v925_v1 }
  0xd8   :  { %801 = vmatprep.subr.bf16.mxu0 %v925_v1 }
 0x192   :  { %v146_v21 = vpop.f32.mrf.mxu1 }
 0x193   :  { %v196_v22 = vsel %vm195_vm4, %v146_v21, -inf }
 0x194   :  { %197 = vmax.xlane.f32.xlu0 %v196_v22  ;;  %v775_v23 = vpop.f32.mrf.mxu1 }
 0x196   :  { %v149_v24 = vpop.f32.mrf.mxu1  ;;  %v189_v25 = vpop.f32.mrf.mxu0 }
 0x197   :  { %v199_v26 = vsel %vm195_vm4, %v189_v25, -inf }
 0x198   :  { %v776_v27 = vpop.f32.mrf.mxu1  ;;  %200 = vmax.xlane.f32.xlu0 %v199_v26  ;;  %v781_v28 = vpop.f32.mrf.mxu0 }
 0x19a   :  { %v192_v29 = vpop.f32.mrf.mxu0 }
 0x19c   :  { %v782_v30 = vpop.f32.mrf.mxu0 }
 0x21d   :  { %v198_v31 = vpop.xlane.xlu0 %197 }
 0x21e   :  { %v202_v32 = vsub.f32 %v146_v21, %v198_v31 }
 0x220   :  { %v204_v33 = vmul.f32 1.442695, %v202_v32 }
 0x221   :  { %v201_v34 = vpop.xlane.xlu0 %200 }
 0x222   :  { %837 = vpow2.f32 %v204_v33  ;;  %v203_v35 = vsub.f32 %v189_v25, %v201_v34 }
 0x224   :  { %v206_v36 = vmul.f32 1.442695, %v203_v35 }
 0x226   :  { %839 = vpow2.f32 %v206_v36 }
 0x22f   :  { %v838_v37 = vpop.eup %837 }
 0x230   :  { %v208_v38 = vsel %vm195_vm4, %v838_v37, 0.0 }
 0x231   :  { %209 = vadd.xlane.f32.xlu1 %v208_v38 }
 0x233   :  { %v840_v39 = vpop.eup %839 }
 0x234   :  { %v211_v40 = vsel %vm195_vm4, %v840_v39, 0.0 }
 0x235   :  { %212 = vadd.xlane.f32.xlu1 %v211_v40 }
 0x2ba   :  { %v210_v41 = vpop.xlane.xlu1 %209 }
 0x2bb   :  { %841 = vrcp.f32 %v210_v41 }
 0x2be   :  { %v213_v42 = vpop.xlane.xlu1 %212 }
 0x2bf   :  { %843 = vrcp.f32 %v213_v42 }
 0x2c8   :  { %v842_v43 = vpop.eup %841 }
 0x2c9   :  { %v216_v44 = vmul.f32 %v842_v43, %v838_v37 }
 0x2cb   :  { %v218_v45 = vpack.c.bf16 %v216_v44, %v216_v44  ;;  %675 = vst.msk [vmem:[#allocation4] sm:$0xff] %vm195_vm4, %v216_v44 }
 0x2cc   :  { %v844_v46 = vpop.eup %843 }
 0x2cd   :  { %786 = vmatmul.mubr.msk.bf16.vlgmr.msra.gmra.mxu1 %vm195_vm4, %v218_v45  ;;  %v217_v47 = vmul.f32 %v844_v46, %v840_v39 }
 0x2ce   :  { %797 = vmatprep.mubr.msk.bf16.mxu1 %vm926_vm1, %v925_v1 }
 0x2cf   :  { %v219_v48 = vpack.c.bf16 %v217_v47, %v217_v47  ;;  %676 = vst.msk [vmem:[#allocation4 + $0x8] sm:$0xff] %vm195_vm4, %v217_v47 }
 0x2d1   :  { %792 = vmatmul.mubr.msk.bf16.vlgmr.msra.gmra.mxu0 %vm195_vm4, %v219_v48 }
 0x2d2   :  { %803 = vmatprep.mubr.msk.bf16.mxu0 %vm926_vm1, %v925_v1 }
 0x38d   :  { %v260_v49 = vpop.f32.mrf.mxu1 }
 0x38e   :  { %v261_v50 = vadd.f32 %v260_v49, %v1021_v9 }
 0x38f   :  { %v787_v51 = vpop.f32.mrf.mxu1 }
 0x390   :  { %v313_v52 = vsel %vm105_vm2, %v261_v50, 0.0 }
 0x391   :  { %v263_v53 = vpop.f32.mrf.mxu1  ;;  %314 = vadd.xlane.f32.xlu0 %v313_v52  ;;  %v305_v54 = vpop.f32.mrf.mxu0 }
 0x392   :  { %v306_v55 = vadd.f32 %v305_v54, %v1021_v9 }
 0x393   :  { %v788_v56 = vpop.f32.mrf.mxu1  ;;  %v793_v57 = vpop.f32.mrf.mxu0 }
 0x394   :  { %v316_v58 = vsel %vm105_vm2, %v306_v55, 0.0 }
 0x395   :  { %317 = vadd.xlane.f32.xlu1 %v316_v58  ;;  %v308_v59 = vpop.f32.mrf.mxu0 }
 0x397   :  { %v794_v60 = vpop.f32.mrf.mxu0 }
 0x41a   :  { %v315_v61 = vpop.xlane.xlu0 %314 }
 0x41b   :  { %v320_v62 = vmul.f32 0.03125, %v315_v61 }
 0x41d   :  { %v322_v63 = vsub.f32 %v261_v50, %v320_v62 }
 0x41e   :  { %v318_v0 = vpop.xlane.xlu1 %317 }
 0x41f   :  { %v321_v2 = vmul.f32 0.03125, %v318_v0  ;;  %v324_v3 = vmul.f32 %v322_v63, %v322_v63 }
 0x421   :  { %v323_v4 = vsub.f32 %v306_v55, %v321_v2  ;;  %v326_v5 = vsel %vm105_vm2, %v324_v3, 0.0 }
 0x422   :  { %327 = vadd.xlane.f32.xlu0 %v326_v5 }
 0x423   :  { %v325_v6 = vmul.f32 %v323_v4, %v323_v4 }
 0x425   :  { %v329_v7 = vsel %vm105_vm2, %v325_v6, 0.0 }
 0x426   :  { %330 = vadd.xlane.f32.xlu1 %v329_v7 }
 0x4ab   :  { %v328_v8 = vpop.xlane.xlu0 %327 }
 0x4ac   :  { %v332_v9 = vmul.f32 0.03125, %v328_v8 }
 0x4ae   :  { %v334_v10 = vadd.f32 1e-05, %v332_v9 }
 0x4af   :  { %v331_v11 = vpop.xlane.xlu1 %330 }
 0x4b0   :  { %845 = vrsqrt.f32 %v334_v10  ;;  %v333_v12 = vmul.f32 0.03125, %v331_v11 }
 0x4b2   :  { %v335_v13 = vadd.f32 1e-05, %v333_v12 }
 0x4b4   :  { %847 = vrsqrt.f32 %v335_v13 }
 0x4bd   :  { %v846_v14 = vpop.eup %845 }
 0x4be   :  { %v338_v16 = vmul.f32 %v846_v14, %v322_v63 }
 0x4c0   :  { %v346_v18 = vmul.f32 %v732_v15, %v338_v16 }
 0x4c1   :  { %v848_v19 = vpop.eup %847 }
 0x4c2   :  { %v1062_v20 = vadd.f32 %v733_v17, %v346_v18  ;;  %v339_v21 = vmul.f32 %v848_v19, %v323_v4  ;;  %v835_v19 = vld [vmem:[%s1142_s8 + $0x8] sm:$0xff]  }
 0x4c4   :  { %v356_v22 = vpack.c.bf16 %v1062_v20, %v1062_v20  ;;  %v347_v23 = vmul.f32 %v732_v15, %v339_v21 }
 0x4c6   :  { %v359_v24 = vsel %vm105_vm2, %v356_v22, 0  ;;  %v1067_v25 = vadd.f32 %v733_v17, %v347_v23  ;;  %v473_v28 = vsel %vm223_vm3, %v356_v22, 0 }
 0x4c7   :  { %796 = vmatpush3.bf16.xpose.msra.mxu1 %v359_v24 }
 0x4c8   :  { %v357_v26 = vpack.c.bf16 %v1067_v25, %v1067_v25  ;;  %807 = vmatprep.subr.bf16.mxu1 %v925_v1 }
 0x4ca   :  { %v402_v27 = vsel %vm105_vm2, %v357_v26, 0  ;;  %v518_v29 = vsel %vm223_vm3, %v357_v26, 0 }
 0x4cb   :  { %802 = vmatpush3.bf16.xpose.msra.mxu0 %v402_v27 }
 0x4cc   :  { %813 = vmatprep.subr.bf16.mxu0 %v925_v1 }
 0x4ce   :  { %798 = vmatmul.mubr.msk.bf16.vlgmr.msra.gmra.mxu1 %vm105_vm2, %v356_v22 }
 0x4cf   :  { %808 = vmatpush3.bf16.msra.mxu1 %v473_v28  ;;  %809 = vmatprep.mubr.msk.bf16.mxu1 %vm926_vm1, %v925_v1 }
 0x4d0   :  { %819 = vmatprep.subr.bf16.mxu1 %v925_v1 }
 0x4d2   :  { %804 = vmatmul.mubr.msk.bf16.vlgmr.msra.gmra.mxu0 %vm105_vm2, %v357_v26 }
 0x4d3   :  { %814 = vmatpush3.bf16.msra.mxu0 %v518_v29  ;;  %815 = vmatprep.mubr.msk.bf16.mxu0 %vm926_vm1, %v925_v1  ;;  %v738_v29 = vld [vmem:[%s1140_s6] ss:$0 sm:$0xff] }
 0x58e   :  { %v395_v30 = vpop.f32.mrf.mxu1 }
 0x58f   :  { %v444_v31 = vmul.f32 0.17677669, %v395_v30 }
 0x590   :  { %v799_v32 = vpop.f32.mrf.mxu1 }
 0x591   :  { %v446_v33 = vsel %vm195_vm4, %v444_v31, -inf }
 0x592   :  { %447 = vmax.xlane.f32.xlu0 %v446_v33  ;;  %v398_v34 = vpop.f32.mrf.mxu1  ;;  %v438_v35 = vpop.f32.mrf.mxu0 }
 0x593   :  { %v445_v36 = vmul.f32 0.17677669, %v438_v35 }
 0x594   :  { %v800_v37 = vpop.f32.mrf.mxu1  ;;  %v805_v38 = vpop.f32.mrf.mxu0 }
 0x595   :  { %v449_v39 = vsel %vm195_vm4, %v445_v36, -inf }
 0x596   :  { %450 = vmax.xlane.f32.xlu1 %v449_v39  ;;  %v441_v40 = vpop.f32.mrf.mxu0 }
 0x598   :  { %v806_v41 = vpop.f32.mrf.mxu0 }
 0x61b   :  { %v448_v42 = vpop.xlane.xlu0 %447 }
 0x61c   :  { %v452_v43 = vsub.f32 %v444_v31, %v448_v42 }
 0x61e   :  { %v454_v44 = vmul.f32 1.442695, %v452_v43 }
 0x61f   :  { %v451_v45 = vpop.xlane.xlu1 %450 }
 0x620   :  { %849 = vpow2.f32 %v454_v44  ;;  %v453_v46 = vsub.f32 %v445_v36, %v451_v45 }
 0x622   :  { %v456_v47 = vmul.f32 1.442695, %v453_v46 }
 0x624   :  { %851 = vpow2.f32 %v456_v47 }
 0x62d   :  { %v850_v48 = vpop.eup %849 }
 0x62e   :  { %v458_v49 = vsel %vm195_vm4, %v850_v48, 0.0 }
 0x62f   :  { %459 = vadd.xlane.f32.xlu0 %v458_v49 }
 0x631   :  { %v852_v50 = vpop.eup %851 }
 0x632   :  { %v461_v51 = vsel %vm195_vm4, %v852_v50, 0.0 }
 0x633   :  { %462 = vadd.xlane.f32.xlu1 %v461_v51 }
 0x6b8   :  { %v460_v52 = vpop.xlane.xlu0 %459 }
 0x6b9   :  { %853 = vrcp.f32 %v460_v52 }
 0x6bc   :  { %v463_v53 = vpop.xlane.xlu1 %462 }
 0x6bd   :  { %855 = vrcp.f32 %v463_v53 }
 0x6c6   :  { %v854_v54 = vpop.eup %853 }
 0x6c7   :  { %v466_v55 = vmul.f32 %v854_v54, %v850_v48 }
 0x6c9   :  { %v468_v56 = vpack.c.bf16 %v466_v55, %v466_v55  ;;  %677 = vst.msk [vmem:[#allocation6] sm:$0xff] %vm195_vm4, %v466_v55 }
 0x6ca   :  { %v856_v57 = vpop.eup %855 }
 0x6cb   :  { %810 = vmatmul.mubr.msk.bf16.vlgmr.msra.gmra.mxu1 %vm195_vm4, %v468_v56  ;;  %v467_v58 = vmul.f32 %v856_v57, %v852_v50 }
 0x6cc   :  { %823 = vmatprep.mubr.msk.bf16.mxu1 %vm926_vm1, %v925_v1  ;;  %820 = vmatpush3.bf16.msra.mxu1 %v835_v19 }
 0x6cd   :  { %v469_v59 = vpack.c.bf16 %v467_v58, %v467_v58  ;;  %678 = vst.msk [vmem:[#allocation6 + $0x8] sm:$0xff] %vm195_vm4, %v467_v58  ;;  %821 = vmatprep.subr.bf16.mxu1 %v925_v1  ;;  %v739_v1 = vld [vmem:[%s1141_s7] ss:$0 sm:$0xff] }
 0x6cf   :  { %816 = vmatmul.mubr.msk.bf16.vlgmr.msra.gmra.mxu0 %vm195_vm4, %v469_v59 }
 0x78b   :  { %v509_v60 = vpop.f32.mrf.mxu1 }
 0x78c   :  { %v510_v61 = vadd.f32 %v509_v60, %v1062_v20  ;;  %v836_v20 = vld [vmem:[%s1142_s8] sm:$0xff]  }
 0x78d   :  { %v811_v62 = vpop.f32.mrf.mxu1  ;;  %822 = vmatpush3.bf16.msra.mxu1 %v836_v20 }
 0x78e   :  { %v562_v63 = vsel %vm105_vm2, %v510_v61, 0.0 }
 0x78f   :  { %563 = vadd.xlane.f32.xlu0 %v562_v63  ;;  %v512_v0 = vpop.f32.mrf.mxu1  ;;  %v554_v2 = vpop.f32.mrf.mxu0 }
 0x790   :  { %v555_v3 = vadd.f32 %v554_v2, %v1067_v25 }
 0x791   :  { %v812_v4 = vpop.f32.mrf.mxu1  ;;  %v817_v5 = vpop.f32.mrf.mxu0 }
 0x792   :  { %v565_v6 = vsel %vm105_vm2, %v555_v3, 0.0 }
 0x793   :  { %566 = vadd.xlane.f32.xlu1 %v565_v6  ;;  %v557_v7 = vpop.f32.mrf.mxu0 }
 0x795   :  { %v818_v8 = vpop.f32.mrf.mxu0 }
 0x818   :  { %v564_v9 = vpop.xlane.xlu0 %563 }
 0x819   :  { %v568_v10 = vmul.f32 0.03125, %v564_v9 }
 0x81b   :  { %v570_v11 = vsub.f32 %v510_v61, %v568_v10 }
 0x81c   :  { %v567_v12 = vpop.xlane.xlu1 %566 }
 0x81d   :  { %v569_v13 = vmul.f32 0.03125, %v567_v12  ;;  %v572_v14 = vmul.f32 %v570_v11, %v570_v11 }
 0x81f   :  { %v571_v15 = vsub.f32 %v555_v3, %v569_v13  ;;  %v574_v16 = vsel %vm105_vm2, %v572_v14, 0.0 }
 0x820   :  { %575 = vadd.xlane.f32.xlu0 %v574_v16 }
 0x821   :  { %v573_v17 = vmul.f32 %v571_v15, %v571_v15 }
 0x823   :  { %v577_v18 = vsel %vm105_vm2, %v573_v17, 0.0 }
 0x824   :  { %578 = vadd.xlane.f32.xlu1 %v577_v18 }
 0x8a9   :  { %v576_v21 = vpop.xlane.xlu0 %575 }
 0x8aa   :  { %v580_v22 = vmul.f32 0.03125, %v576_v21 }
 0x8ac   :  { %v582_v23 = vadd.f32 1e-05, %v580_v22 }
 0x8ad   :  { %v579_v24 = vpop.xlane.xlu1 %578 }
 0x8ae   :  { %857 = vrsqrt.f32 %v582_v23  ;;  %v581_v25 = vmul.f32 0.03125, %v579_v24 }
 0x8b0   :  { %v583_v26 = vadd.f32 1e-05, %v581_v25 }
 0x8b2   :  { %859 = vrsqrt.f32 %v583_v26 }
 0x8bb   :  { %v858_v27 = vpop.eup %857 }
 0x8bc   :  { %v586_v28 = vmul.f32 %v858_v27, %v570_v11 }
 0x8be   :  { %v594_v32 = vmul.f32 %v738_v29, %v586_v28 }
 0x8bf   :  { %v860_v30 = vpop.eup %859 }
 0x8c0   :  { %v587_v31 = vmul.f32 %v860_v30, %v571_v15  ;;  %v602_v34 = vadd.f32 %v739_v1, %v594_v32 }
 0x8c2   :  { %v595_v33 = vmul.f32 %v738_v29, %v587_v31 }
 0x8c4   :  { %v603_v35 = vadd.f32 %v739_v1, %v595_v33 }
 0x8c6   :  { %v604_v36 = vpack.c.bf16 %v603_v35, %v602_v34 }
 0x8c8   :  { %824 = vmatmul.mubr.msk.bf16.vlgmr.msra.gmra.mxu1 %vm105_vm2, %v604_v36 }
 0x8c9   :  { %872 = shalt.err (!%p869_p4)
}
 0x8ca   :  { %s928_s6 = smov 128   ;;  %s929_s21 = smov 8  }
 0x8cb   :  { %702 = dma.vmem_to_hbm [thread:$0]  %s697_s19, 256, %s1145_s11, [#allocation5], %s928_s6, %s928_s6, %s929_s21  }
 0x8cc   :  { %s930_s23 = smov [#allocation6]  }
 0x8cd   :  { %s708_s24 = sshll.u32 %s930_s23, 4  ;;  %s709_s24 = int_to_ptr.vmem [resolvable:$true] %s708_s24 }
 0x8ce   :  { %s881_s25 = scalar_lea.vmem %s709_s24, 256  ;;  %p886_p6 = scmp.lt.s32.totalorder %s709_s24, %s709_s24 }
 0x8cf   :  { %p882_p5 = scmp.ne.s32.totalorder %s709_s24, %s881_s25  ;;  %p887_p7 = scmp.lt.s32.totalorder %s881_s25, %s881_s25 }
 0x8d1   :  { %p888_p8 = por %p887_p7, %p886_p6 }
 0x8d3   :  { %p889_p9 = pnand %p888_p8, %p882_p5 }
 0x8d5   :  { %892 = shalt.err (!%p889_p9)
}
 0x8d6   :  { %714 = dma.vmem_to_hbm [thread:$0]  %s709_s24, 256, %s1146_s12, [#allocation5], %s928_s6, %s928_s6, %s929_s21   ;;  %vm672_vm5 = vcmask 97280  }
 0x8d7   :  { %v740_v37 = vld [vmem:[%s1143_s9] ss:$0 sm:$0xff]  ;;  %s931_s11 = smov [#allocation2]  }
 0x8d8   :  { %s684_s28 = sshll.u32 %s931_s11, 4  ;;  %s685_s28 = int_to_ptr.vmem [resolvable:$true] %s684_s28 }
 0x8d9   :  { %s901_s2 = scalar_lea.vmem %s685_s28, 256  ;;  %p906_p11 = scmp.lt.s32.totalorder %s685_s28, %s685_s28 }
 0x8da   :  { %p902_p10 = scmp.ne.s32.totalorder %s685_s28, %s901_s2  ;;  %p907_p12 = scmp.lt.s32.totalorder %s901_s2, %s901_s2 }
 0x8dc   :  { %p908_p13 = por %p907_p12, %p906_p11 }
 0x8de   :  { %p909_p0 = pnand %p908_p13, %p902_p10 }
 0x988   :  { %v665_v38 = vpop.f32.mrf.mxu1 }
 0x989   :  { %v666_v39 = vadd.f32 %v740_v37, %v665_v38 }
 0x98a   :  { %v825_v40 = vpop.f32.mrf.mxu1 }
 0x98b   :  { %673 = vst.msk [vmem:[#allocation2] sm:$0xff] %vm672_vm5, %v666_v39 }
 0x98c   :  { %v668_v41 = vpop.f32.mrf.mxu1 }
 0x98d   :  { %v669_v42 = vadd.f32 %v740_v37, %v668_v41 }
 0x98e   :  { %v826_v43 = vpop.f32.mrf.mxu1 }
 0x98f   :  { %674 = vst.msk [vmem:[#allocation2 + $0x8] sm:$0xff] %vm672_vm5, %v669_v42 }
 0x990   :  { %912 = shalt.err (!%p909_p0)
}
 0x991   :  { %690 = dma.vmem_to_hbm [thread:$0]  %s685_s28, 256, %s1144_s10, [#allocation3], %s928_s6, %s928_s6, %s929_s21  }
 0x992   :  { %921 = dma.done.wait [#allocation3], 256  }
 0x993   :  { %922 = vsyncadd [#allocation3], 4294967040 }
 0x994   :  { %923 = dma.done.wait [#allocation5], 512  }
 0x995   :  { %924 = vsyncadd [#allocation5], 4294966784 }
 0x996   :  { %724 = vsyncpa [#allocation3], 1 }
 0x997   :  { %725 = vsyncpa [#allocation5], 1 }

</bundles_post_ra>
